<compile_context>
chip_gen: v7x
topology: tpu7x:2x2x1
jax: 0.10.0
libtpu: 0.0.40
codegen_flags: <defaults>
</compile_context>

<pallas_src>
import functools

import jax
import jax.numpy as jnp
import numpy as np
from jax.experimental import pallas as pl
from jax.experimental.pallas import tpu as pltpu


def _round_up(x, m):
    return ((x + m - 1) // m) * m


def _conv2d_same_kernel(x_ref, halo_ref, w_ref, b_ref, o_ref, win_ref, s2_ref,
                        *, k, wp, cin_p, ts, fold):
    """One (spatial tile t, batch b) grid step.

    x_ref:    (1, Cin_p, TS)        current flattened-spatial tile
    halo_ref: (1, Cin_p, TH)        next TH flattened positions (halo)
    w_ref:    (Cout, k*k*Cin_p)     packed weights (zero cols for Cin padding)
    b_ref:    (Cout, 1)             bias (fp32)
    o_ref:    (1, Cout, TS)         output tile (lane-dense store)
    win_ref:  (Cin_p, TS+TH) VMEM   tile+halo window (lane-aligned stores)
    s2_ref:   fold:  (k*k*Cin_p, TS) VMEM  im2col scratch
              else:  (Cout, TS) fp32 VMEM  accumulator
    """
    th = win_ref.shape[1] - ts
    # Assemble the lane-contiguous window in VMEM.  Both stores are lane- and
    # sublane-aligned, and nothing of size O(Cin*TS) stays live in vregs.
    win_ref[:, pl.ds(0, ts)] = x_ref[0]
    win_ref[:, pl.ds(ts, th)] = halo_ref[0]

    if fold:
        # Small cin: im2col-fold the k*k taps into sublane-aligned row blocks
        # of the scratch, then one fat MXU matmul over the folded contraction.
        # All scratch rows are rewritten every step (safe under parallel grid).
        for dy in range(k):
            for dx in range(k):
                tap = dy * k + dx
                shift = dy * wp + dx                       # static lane offset
                s2_ref[pl.ds(tap * cin_p, cin_p), :] = win_ref[:, pl.ds(shift, ts)]
        acc = jnp.dot(w_ref[...], s2_ref[...],
                      preferred_element_type=jnp.float32)  # (Cout, TS)
        o_ref[0] = (acc + b_ref[...].astype(jnp.float32)).astype(o_ref.dtype)
    else:
        # Large cin: per-tap contraction already >= MXU depth, so skip the
        # scratch round-trip and accumulate k*k dots in an fp32 accumulator.
        for dy in range(k):
            for dx in range(k):
                tap = dy * k + dx
                shift = dy * wp + dx
                contrib = jnp.dot(w_ref[:, pl.ds(tap * cin_p, cin_p)],
                                  win_ref[:, pl.ds(shift, ts)],
                                  preferred_element_type=jnp.float32)
                if tap == 0:
                    s2_ref[...] = contrib
                else:
                    s2_ref[...] += contrib
        o_ref[0] = (s2_ref[...] + b_ref[...].astype(jnp.float32)).astype(o_ref.dtype)


def _vmem_budget_bytes():
    try:
        phys = int(pltpu.get_tpu_info().vmem_capacity_bytes)
    except Exception:
        phys = 64 << 20          # conservative fallback (v7x per-core VMEM)
    return max(32 << 20, int(phys * 0.7))


def conv2d_same(x_nchw, weight_oihw, bias, kernel_size, *,
                spatial_tile=8192, compute_dtype=None):
    """Matches Conv2dSame.forward: ReflectionPad2d((ka, kb, ka, kb)) + Conv2d(k, stride=1)."""
    k = int(kernel_size)
    n, cin, h, w = x_nchw.shape
    cout = weight_oihw.shape[0]
    ka = k // 2
    kb = ka - 1 if k % 2 == 0 else ka

    cdt = jnp.dtype(compute_dtype) if compute_dtype is not None else jnp.dtype(x_nchw.dtype)
    itemsize = cdt.itemsize
    sub = {4: 8, 2: 16, 1: 32}[itemsize]      # sublane packing per dtype
    cin_p = _round_up(cin, sub)
    kk = k * k
    fold = cin_p < 128       # large cin: skip im2col scratch, per-tap accumulating dots

    # Reflection pad (left, right, top, bottom) = (ka, kb, ka, kb), NCHW.
    # TODO(synk): fuse the reflection pad into the kernel (extra HBM pass).
    x_pad = jnp.pad(x_nchw, ((0, 0), (0, 0), (ka, kb), (ka, kb)), mode="reflect")
    hp, wp = h + k - 1, w + k - 1

    # For large images, pad the row stride to a lane multiple so dy*Wp tap
    # shifts are 128-aligned (k distinct rotates instead of k*k).  Skipped for
    # small W where the inflation outweighs the saved XLU work.
    wp_work = _round_up(wp, 128) if wp >= 128 else wp
    if wp_work != wp:
        x_pad = jnp.pad(x_pad, ((0, 0), (0, 0), (0, 0), (0, wp_work - wp)))
    s = hp * wp_work                          # flattened padded spatial size

    # Tile geometry: lane-dense spatial tiles (multiple of TH) + aligned halo.
    max_shift = (k - 1) * wp_work + (k - 1)   # largest tap offset, flat space
    th = max(128, _round_up(max_shift, 128))  # halo tile (multiple of 128)
    ts = _round_up(max(min(spatial_tile, _round_up(s, 128)), th), th)

    # Shrink TS against the per-chip VMEM budget (v7x: 64 MiB physical).
    budget = _vmem_budget_bytes()

    def footprint(ts_):
        win = cin_p * (ts_ + th) * itemsize
        s2 = kk * cin_p * ts_ * itemsize if fold else cout * ts_ * 4
        blocks = 2 * (cin_p * ts_ + cin_p * th + cout * ts_) * itemsize
        wts = 2 * (cout * kk * cin_p * itemsize + cout * 4)
        return win + s2 + blocks + wts

    while ts > th and footprint(ts) > budget:
        ts = max(1, (ts // th) // 2) * th

    nt = -(-s // ts)                          # number of spatial tiles
    sp_in = nt * ts + th                      # padded flat input length

    # Flatten spatial, pad channels to cin_p (zeros, done once here — no
    # per-tap concat in the kernel) and pad the spatial tail so every
    # (tile + halo) window is in bounds.
    xf = jnp.pad(x_pad.reshape(n, cin, s).astype(cdt),
                 ((0, 0), (0, cin_p - cin), (0, sp_in - s)))

    # Pack weights for the folded contraction: (Cout, k*k*Cin_p).  Padded
    # channel columns carry zero weights.
    w_pk = jnp.zeros((cout, kk, cin_p), dtype=cdt)
    w_pk = w_pk.at[:, :, :cin].set(
        jnp.transpose(weight_oihw.reshape(cout, cin, kk), (0, 2, 1)).astype(cdt))
    w_pk = w_pk.reshape(cout, kk * cin_p)
    b2d = bias.reshape(cout, 1).astype(jnp.float32)

    kernel = functools.partial(_conv2d_same_kernel, k=k, wp=wp_work,
                               cin_p=cin_p, ts=ts, fold=fold)

    cost = pl.CostEstimate(
        flops=int(2 * n * nt * ts * kk * cin_p * cout),   # what the kernel computes
        transcendentals=0,
        bytes_accessed=int((n * nt * (ts + th) * cin_p
                            + cout * kk * cin_p
                            + n * nt * ts * cout) * itemsize + cout * 4))

    s2_scratch = (pltpu.VMEM((kk * cin_p, ts), cdt) if fold
                  else pltpu.VMEM((cout, ts), jnp.float32))

    of = pl.pallas_call(
        kernel,
        out_shape=jax.ShapeDtypeStruct((n, cout, nt * ts), x_nchw.dtype),
        grid=(nt, n),                         # spatial axis first: megacore splits nt
        in_specs=[
            # current spatial tile
            pl.BlockSpec((1, cin_p, ts), lambda t, b: (b, 0, t)),
            # halo: the next TH flattened positions (same array, second spec)
            pl.BlockSpec((1, cin_p, th), lambda t, b: (b, 0, (t + 1) * (ts // th))),
            # packed weights / bias: resident, fetched once
            pl.BlockSpec((cout, kk * cin_p), lambda t, b: (0, 0)),
            pl.BlockSpec((cout, 1), lambda t, b: (0, 0)),
        ],
        out_specs=pl.BlockSpec((1, cout, ts), lambda t, b: (b, 0, t)),
        scratch_shapes=[pltpu.VMEM((cin_p, ts + th), cdt), s2_scratch],
        compiler_params=pltpu.CompilerParams(
            dimension_semantics=("parallel", "parallel"),
            vmem_limit_bytes=int(budget)),
        cost_estimate=cost,
    )(xf, xf, w_pk, b2d)

    # Valid outputs live at flat positions y*Wp_work + x with y < H, x < W.
    # TODO(synk): write only valid columns in-kernel to drop this extra pass.
    return of[:, :, :s].reshape(n, cout, hp, wp_work)[:, :, :h, :w]


if __name__ == "__main__":
    def reference(x, weight, bias, k):
        ka = k // 2
        kb = ka - 1 if k % 2 == 0 else ka
        x_pad = jnp.pad(x, ((0, 0), (0, 0), (ka, kb), (ka, kb)), mode="reflect")
        return jax.lax.conv_general_dilated(
            x_pad, weight, window_strides=(1, 1), padding="VALID",
            dimension_numbers=("NCHW", "OIHW", "NCHW"),
            precision=jax.lax.Precision.HIGHEST,
        ) + bias[None, :, None, None]

    key = jax.random.PRNGKey(0)

    # Case 1: Conv2dSame(4, 8, kernel_size=3) — small-cin (im2col-fold) path.
    N, Cin, Hs, Ws, Cout, K = 2, 4, 16, 16, 8, 3
    k1, k2, k3, key = jax.random.split(key, 4)
    x = jax.random.normal(k1, (N, Cin, Hs, Ws), dtype=jnp.float32)
    fan_in = Cin * K * K
    bound = 1.0 / np.sqrt(fan_in)
    w1 = jax.random.uniform(k2, (Cout, Cin, K, K), jnp.float32, -bound, bound)
    b1 = jax.random.uniform(k3, (Cout,), jnp.float32, -bound, bound)
    ref1 = np.asarray(reference(x, w1, b1, K))

    # spatial_tile=256 -> a (2, 2) grid at this size, exercising the tiling.
    out = jax.block_until_ready(conv2d_same(x, w1, b1, K, spatial_tile=256))
    assert out.shape == (N, Cout, Hs, Ws), out.shape
    np.testing.assert_allclose(np.asarray(out), ref1, rtol=1e-4, atol=1e-4)

    # Default (large) tile: single spatial tile per image.
    out = jax.block_until_ready(conv2d_same(x, w1, b1, K))
    np.testing.assert_allclose(np.asarray(out), ref1, rtol=1e-4, atol=1e-4)

    # Case 2: Conv2dSame(128, 16, kernel_size=3) — large-cin (per-tap dot) path.
    N2, Cin2, H2, W2, Cout2 = 1, 128, 8, 8, 16
    k4, k5, k6, key = jax.random.split(key, 4)
    x2 = jax.random.normal(k4, (N2, Cin2, H2, W2), dtype=jnp.float32)
    fan_in2 = Cin2 * K * K
    bound2 = 1.0 / np.sqrt(fan_in2)
    w2 = jax.random.uniform(k5, (Cout2, Cin2, K, K), jnp.float32, -bound2, bound2)
    b2 = jax.random.uniform(k6, (Cout2,), jnp.float32, -bound2, bound2)

    out2 = jax.block_until_ready(conv2d_same(x2, w2, b2, K))
    assert out2.shape == (N2, Cout2, H2, W2), out2.shape
    np.testing.assert_allclose(np.asarray(out2), np.asarray(reference(x2, w2, b2, K)),
                               rtol=2e-3, atol=2e-3)

    print("KERNEL_OK")
</pallas_src>

<mosaic_0001>
module attributes {stable_mosaic.version = 11 : i64} {
  func.func @_conv2d_same_kernel(%arg0: i32, %arg1: i32, %arg2: memref<1x8x256xf32, #tpu.memory_space<vmem>>, %arg3: memref<1x8x128xf32, #tpu.memory_space<vmem>>, %arg4: memref<8x72xf32, #tpu.memory_space<vmem>>, %arg5: memref<8x1xf32, #tpu.memory_space<vmem>>, %arg6: memref<1x8x256xf32, #tpu.memory_space<vmem>>, %arg7: memref<8x384xf32, #tpu.memory_space<vmem>>, %arg8: memref<72x256xf32, #tpu.memory_space<vmem>>) attributes {dimension_semantics = [#tpu.dimension_semantics<parallel>, #tpu.dimension_semantics<parallel>], iteration_bounds = array<i64: 2, 2>, scalar_prefetch = 0 : i64, scratch_operands = 2 : i64, tpu.core_type = #tpu.core_type<tc>, window_params = [{transform_indices = @transform_0, window_bounds = array<i64: 1, 8, 256>}, {transform_indices = @transform_1, window_bounds = array<i64: 1, 8, 128>}, {pipeline_mode = #tpu.pipeline_mode<synchronous>, transform_indices = @transform_2, window_bounds = array<i64: 8, 72>}, {pipeline_mode = #tpu.pipeline_mode<synchronous>, transform_indices = @transform_3, window_bounds = array<i64: 8, 1>}, {transform_indices = @transform_4, window_bounds = array<i64: 1, 8, 256>}]} {
    %c0 = arith.constant 0 : index
    %c0_0 = arith.constant 0 : index
    %c0_1 = arith.constant 0 : index
    %0 = vector.load %arg2[%c0, %c0_0, %c0_1] : memref<1x8x256xf32, #tpu.memory_space<vmem>>, vector<1x8x256xf32>
    %1 = vector.shape_cast %0 : vector<1x8x256xf32> to vector<8x256xf32>
    %c0_2 = arith.constant 0 : index
    %c0_3 = arith.constant 0 : index
    %2 = vector.load %arg7[%c0_2, %c0_3] : memref<8x384xf32, #tpu.memory_space<vmem>>, vector<8x256xf32>
    tpu.vector_store %arg7[%c0_2, %c0_3], %1 {strides = array<i32>} : memref<8x384xf32, #tpu.memory_space<vmem>>, vector<8x256xf32>,
    %c0_4 = arith.constant 0 : index
    %c0_5 = arith.constant 0 : index
    %c0_6 = arith.constant 0 : index
    %3 = vector.load %arg3[%c0_4, %c0_5, %c0_6] : memref<1x8x128xf32, #tpu.memory_space<vmem>>, vector<1x8x128xf32>
    %4 = vector.shape_cast %3 : vector<1x8x128xf32> to vector<8x128xf32>
    %c0_7 = arith.constant 0 : index
    %c256 = arith.constant 256 : index
    %5 = vector.load %arg7[%c0_7, %c256] : memref<8x384xf32, #tpu.memory_space<vmem>>, vector<8x128xf32>
    tpu.vector_store %arg7[%c0_7, %c256], %4 {strides = array<i32>} : memref<8x384xf32, #tpu.memory_space<vmem>>, vector<8x128xf32>,
    %c0_8 = arith.constant 0 : index
    %c0_9 = arith.constant 0 : index
    %6 = vector.load %arg7[%c0_8, %c0_9] : memref<8x384xf32, #tpu.memory_space<vmem>>, vector<8x256xf32>
    %c0_10 = arith.constant 0 : index
    %c0_11 = arith.constant 0 : index
    %7 = vector.load %arg8[%c0_10, %c0_11] : memref<72x256xf32, #tpu.memory_space<vmem>>, vector<8x256xf32>
    tpu.vector_store %arg8[%c0_10, %c0_11], %6 {strides = array<i32>} : memref<72x256xf32, #tpu.memory_space<vmem>>, vector<8x256xf32>,
    %c0_12 = arith.constant 0 : index
    %c1 = arith.constant 1 : index
    %8 = vector.load %arg7[%c0_12, %c1] : memref<8x384xf32, #tpu.memory_space<vmem>>, vector<8x256xf32>
    %c8 = arith.constant 8 : index
    %c0_13 = arith.constant 0 : index
    %9 = vector.load %arg8[%c8, %c0_13] : memref<72x256xf32, #tpu.memory_space<vmem>>, vector<8x256xf32>
    tpu.vector_store %arg8[%c8, %c0_13], %8 {strides = array<i32>} : memref<72x256xf32, #tpu.memory_space<vmem>>, vector<8x256xf32>,
    %c0_14 = arith.constant 0 : index
    %c2 = arith.constant 2 : index
    %10 = vector.load %arg7[%c0_14, %c2] : memref<8x384xf32, #tpu.memory_space<vmem>>, vector<8x256xf32>
    %c16 = arith.constant 16 : index
    %c0_15 = arith.constant 0 : index
    %11 = vector.load %arg8[%c16, %c0_15] : memref<72x256xf32, #tpu.memory_space<vmem>>, vector<8x256xf32>
    tpu.vector_store %arg8[%c16, %c0_15], %10 {strides = array<i32>} : memref<72x256xf32, #tpu.memory_space<vmem>>, vector<8x256xf32>,
    %c0_16 = arith.constant 0 : index
    %c18 = arith.constant 18 : index
    %12 = vector.load %arg7[%c0_16, %c18] : memref<8x384xf32, #tpu.memory_space<vmem>>, vector<8x256xf32>
    %c24 = arith.constant 24 : index
    %c0_17 = arith.constant 0 : index
    %13 = vector.load %arg8[%c24, %c0_17] : memref<72x256xf32, #tpu.memory_space<vmem>>, vector<8x256xf32>
    tpu.vector_store %arg8[%c24, %c0_17], %12 {strides = array<i32>} : memref<72x256xf32, #tpu.memory_space<vmem>>, vector<8x256xf32>,
    %c0_18 = arith.constant 0 : index
    %c19 = arith.constant 19 : index
    %14 = vector.load %arg7[%c0_18, %c19] : memref<8x384xf32, #tpu.memory_space<vmem>>, vector<8x256xf32>
    %c32 = arith.constant 32 : index
    %c0_19 = arith.constant 0 : index
    %15 = vector.load %arg8[%c32, %c0_19] : memref<72x256xf32, #tpu.memory_space<vmem>>, vector<8x256xf32>
    tpu.vector_store %arg8[%c32, %c0_19], %14 {strides = array<i32>} : memref<72x256xf32, #tpu.memory_space<vmem>>, vector<8x256xf32>,
    %c0_20 = arith.constant 0 : index
    %c20 = arith.constant 20 : index
    %16 = vector.load %arg7[%c0_20, %c20] : memref<8x384xf32, #tpu.memory_space<vmem>>, vector<8x256xf32>
    %c40 = arith.constant 40 : index
    %c0_21 = arith.constant 0 : index
    %17 = vector.load %arg8[%c40, %c0_21] : memref<72x256xf32, #tpu.memory_space<vmem>>, vector<8x256xf32>
    tpu.vector_store %arg8[%c40, %c0_21], %16 {strides = array<i32>} : memref<72x256xf32, #tpu.memory_space<vmem>>, vector<8x256xf32>,
    %c0_22 = arith.constant 0 : index
    %c36 = arith.constant 36 : index
    %18 = vector.load %arg7[%c0_22, %c36] : memref<8x384xf32, #tpu.memory_space<vmem>>, vector<8x256xf32>
    %c48 = arith.constant 48 : index
    %c0_23 = arith.constant 0 : index
    %19 = vector.load %arg8[%c48, %c0_23] : memref<72x256xf32, #tpu.memory_space<vmem>>, vector<8x256xf32>
    tpu.vector_store %arg8[%c48, %c0_23], %18 {strides = array<i32>} : memref<72x256xf32, #tpu.memory_space<vmem>>, vector<8x256xf32>,
    %c0_24 = arith.constant 0 : index
    %c37 = arith.constant 37 : index
    %20 = vector.load %arg7[%c0_24, %c37] : memref<8x384xf32, #tpu.memory_space<vmem>>, vector<8x256xf32>
    %c56 = arith.constant 56 : index
    %c0_25 = arith.constant 0 : index
    %21 = vector.load %arg8[%c56, %c0_25] : memref<72x256xf32, #tpu.memory_space<vmem>>, vector<8x256xf32>
    tpu.vector_store %arg8[%c56, %c0_25], %20 {strides = array<i32>} : memref<72x256xf32, #tpu.memory_space<vmem>>, vector<8x256xf32>,
    %c0_26 = arith.constant 0 : index
    %c38 = arith.constant 38 : index
    %22 = vector.load %arg7[%c0_26, %c38] : memref<8x384xf32, #tpu.memory_space<vmem>>, vector<8x256xf32>
    %c64 = arith.constant 64 : index
    %c0_27 = arith.constant 0 : index
    %23 = vector.load %arg8[%c64, %c0_27] : memref<72x256xf32, #tpu.memory_space<vmem>>, vector<8x256xf32>
    tpu.vector_store %arg8[%c64, %c0_27], %22 {strides = array<i32>} : memref<72x256xf32, #tpu.memory_space<vmem>>, vector<8x256xf32>,
    %c0_28 = arith.constant 0 : index
    %c0_29 = arith.constant 0 : index
    %24 = vector.load %arg4[%c0_28, %c0_29] : memref<8x72xf32, #tpu.memory_space<vmem>>, vector<8x72xf32>
    %c0_30 = arith.constant 0 : index
    %c0_31 = arith.constant 0 : index
    %25 = vector.load %arg8[%c0_30, %c0_31] : memref<72x256xf32, #tpu.memory_space<vmem>>, vector<72x256xf32>
    %cst = arith.constant dense<0.000000e+00> : vector<8x256xf32>
    %26 = tpu.matmul %24, %25, %cst {dimension_numbers = #tpu.dot_dimension_numbers<[1], [0], [0], [1], [0, 0, 1, 1], [], []>} : vector<8x72xf32>, vector<72x256xf32>, vector<8x256xf32> -> vector<8x256xf32>
    %c0_32 = arith.constant 0 : index
    %c0_33 = arith.constant 0 : index
    %27 = vector.load %arg5[%c0_32, %c0_33] : memref<8x1xf32, #tpu.memory_space<vmem>>, vector<8x1xf32>
    %28 = vector.broadcast %27 : vector<8x1xf32> to vector<8x256xf32>
    %29 = arith.addf %26, %28 : vector<8x256xf32>
    %c0_34 = arith.constant 0 : index
    %c0_35 = arith.constant 0 : index
    %c0_36 = arith.constant 0 : index
    %30 = vector.load %arg6[%c0_34, %c0_35, %c0_36] : memref<1x8x256xf32, #tpu.memory_space<vmem>>, vector<1x8x256xf32>
    %31 = vector.shape_cast %30 : vector<1x8x256xf32> to vector<8x256xf32>
    %32 = vector.shape_cast %29 : vector<8x256xf32> to vector<1x8x256xf32>
    tpu.vector_store %arg6[%c0_34, %c0_35, %c0_36], %32 {strides = array<i32>} : memref<1x8x256xf32, #tpu.memory_space<vmem>>, vector<1x8x256xf32>,
    return
  }
  func.func @transform_0(%arg0: i32, %arg1: i32) -> (i32, i32, i32) {
    %c0_i32 = arith.constant 0 : i32
    %c0_i32_0 = arith.constant 0 : i32
    return %arg1, %c0_i32, %arg0 : i32, i32, i32
  }
  func.func @transform_1(%arg0: i32, %arg1: i32) -> (i32, i32, i32) {
    %c1_i32 = arith.constant 1 : i32
    %0 = arith.addi %arg0, %c1_i32 : i32
    %c2_i32 = arith.constant 2 : i32
    %1 = arith.muli %0, %c2_i32 : i32
    %c0_i32 = arith.constant 0 : i32
    %c0_i32_0 = arith.constant 0 : i32
    return %arg1, %c0_i32, %1 : i32, i32, i32
  }
  func.func @transform_2(%arg0: i32, %arg1: i32) -> (i32, i32) {
    %c0_i32 = arith.constant 0 : i32
    %c0_i32_0 = arith.constant 0 : i32
    %c0_i32_1 = arith.constant 0 : i32
    return %c0_i32, %c0_i32_0 : i32, i32
  }
  func.func @transform_3(%arg0: i32, %arg1: i32) -> (i32, i32) {
    %c0_i32 = arith.constant 0 : i32
    %c0_i32_0 = arith.constant 0 : i32
    %c0_i32_1 = arith.constant 0 : i32
    return %c0_i32, %c0_i32_0 : i32, i32
  }
  func.func @transform_4(%arg0: i32, %arg1: i32) -> (i32, i32, i32) {
    %c0_i32 = arith.constant 0 : i32
    %c0_i32_0 = arith.constant 0 : i32
    return %arg1, %c0_i32, %arg0 : i32, i32, i32
  }
}

</mosaic_0001>

<bundles_post_ra>
// kernel: tpu_custom_call.1
= control target key start
LH: loop header
LB: loop body
LE: loop exit
PB: predicated region body
PF: predicated region fallthrough
CT: control target
= control target key end

     0   :  { %s1386_s0 = inlined_call_operand.hbm [shape: f32[2,8,640], index: 0, kind: input, shape index: {}]   ;;  %s1387_s1 = inlined_call_operand.hbm [shape: f32[2,8,640], index: 1, kind: input, shape index: {}]   ;;  %s1388_s2 = inlined_call_operand.vmem [shape: f32[8,72], index: 2, kind: input, shape index: {}]   ;;  %s1389_s3 = inlined_call_operand.vmem [shape: f32[8,1], index: 3, kind: input, shape index: {}]   ;;  %s1390_s4 = inlined_call_operand.hbm [shape: f32[2,8,512], index: 4, kind: output, shape index: {}]  }
   0x1   :  { %1403 = sst [smem:[#allocation22_spill]] %s1388_s2 }
   0x2   :  { %1404 = sst [smem:[#allocation23_spill]] %s1390_s4 }
   0x3   :  { %9 = vsyncpa [#allocation5], 0 }
   0x4   :  { %11 = vsyncpa [#allocation5 + $0x1], 0 }
   0x5   :  { %12 = vsyncpa [#allocation8], 0 }
   0x6   :  { %14 = vsyncpa [#allocation8 + $0x1], 0 }
   0x7   :  { %15 = vsyncpa [#allocation6], 0 }
   0x8   :  { %17 = vsyncpa [#allocation6 + $0x1], 0  ;;  %s1106_s15 = smov 0   ;;  %s1108_s16 = smov 0  }
   0x9   :  { %s1110_s17 = smov 0   ;;  %s1112_s18 = smov 0  }
   0xa   :  { %s1114_s19 = smov 0   ;;  %s1116_s20 = smov 0  }
   0xb   :  { %s1118_s21 = smov 0   ;;  %s1120_s22 = smov 0  }
   0xc   :  { %s1122_s23 = smov 0   ;;  %s1124_s24 = smov 0  }
   0xd   :  { %s1126_s25 = smov 0  }
   0xe LB: > { %1405 = sst [smem:[#allocation13_spill]] %s1038_s18  ;;  %s1391_s26 = sadd.s32 4294967295, %s1066_s25   ;;  %s1066_s25 = sphi %s1126_s25, %s23_s25   ;;  %s1062_s24 = sphi %s1124_s24, %s1436_s24   ;;  %s1058_s23 = sphi %s1122_s23, %s1443_s23   ;;  %s1054_s22 = sphi %s1120_s22, %s1434_s22   ;;  %s1050_s21 = sphi %s1118_s21, %s1442_s21   ;;  %s1046_s20 = sphi %s1116_s20, %s1433_s20   ;;  %s1042_s19 = sphi %s1114_s19, %s1441_s19   ;;  %s1038_s18 = sphi %s1112_s18, %s1440_s18   ;;  %s1034_s17 = sphi %s1110_s17, %s1439_s17   ;;  %s1030_s16 = sphi %s1108_s16, %s1438_s16   ;;  %s1026_s15 = sphi %s1106_s15, %s1437_s15  }
   0xf   : > { %1406 = sst [smem:[#allocation14_spill]] %s1046_s20  ;;  %s32_s28 = sadd.s32 1, %s1058_s23 }
  0x10   : > { %1407 = sst [smem:[#allocation15_spill]] %s1062_s24  ;;  %s35_s29 = sadd.s32 1, %s1062_s24 }
  0x11   : > { %p33_p0 = scmp.ge.s32.totalorder %s32_s28, 2  ;;  %s44_s30 = sadd.s32 1, %s1046_s20 }
  0x12   : > { %p51_p1 = scmp.ne.s32.totalorder %s1046_s20, %s1042_s19  ;;  %p52_p2 = scmp.eq.s32.totalorder %s1066_s25, 0 }
  0x13   : > { %s1445_s28 = smov (%p33_p0, %s32_s28), 0  ;;  %s1447_s29 = smov (!%p33_p0, %s35_s29), %s1062_s24 }
  0x14   : > { %1408 = sst [smem:[#allocation16_spill]] %s1445_s28  ;;  %s39_s5 = ssub.s32 %s1058_s23, %s1445_s28 }
  0x15   : > { %p1179_p3 = por %p52_p2, %p51_p1  ;;  %p37_p4 = scmp.ge.s32.totalorder %s1447_s29, 2 }
  0x16   : > { %p57_p5 = scmp.ne.s32.totalorder %s1042_s19, %s1038_s18  ;;  %p1187_p6 = scmp.eq.s32.totalorder %s1391_s26, 0 }
  0x17   : > { %s1192_s8 = sshll.u32 %s1062_s24, 1  ;;  %s1449_s29 = smov (%p37_p4, %s1447_s29), 0 }
  0x18   : > { %1411 = sst [smem:[#allocation17_spill]] %s1449_s29  ;;  %p1201_p7 = por %p1187_p6, %p57_p5 }
  0x19   : > { %s716_s10 = sadd.s32 2, %s1192_s8  ;;  %s40_s11 = ssub.s32 %s1062_s24, %s1449_s29 }
  0x1a   : > { %s717_s12 = sshll.u32 %s1449_s29, 1  ;;  %s41_s13 = sor.u32 %s40_s11, %s39_s5 }
  0x1b   : > { %s718_s14 = sadd.s32 2, %s717_s12  ;;  %p42_p8 = scmp.eq.s32.totalorder %s41_s13, 0 }
  0x1c   : > { %s72_s27 = ssub.s32 %s716_s10, %s718_s14  ;;  %s76_s28 = sadd.s32 1, %s1034_s17 }
  0x1d   : > { %s73_s26 = sor.u32 %s72_s27, %s39_s5  ;;  %p83_p10 = scmp.ne.s32.totalorder %s1034_s17, %s1030_s16 }
  0x1e   : > { %s1211_s4 = scalar_select %p42_p8, %s1046_s20, %s44_s30  }
  0x1f   : > { %p74_p9 = scmp.eq.s32.totalorder %s73_s26, 0  ;;  %p89_p11 = scmp.ne.s32.totalorder %s1030_s16, %s1026_s15 }
  0x20   : > { %1413 = sst [smem:[#allocation18_spill]] %s1211_s4  ;;  %s1414_s2 = sadd.s32 4294967295, %s1066_s25  }
  0x21   : > { %p157_p12 = scmp.eq.s32.totalorder %s1414_s2, 3  ;;  %p1224_p13 = por %p83_p10, %p52_p2 }
  0x22   : > { %s1220_s24 = scalar_select %p74_p9, %s1034_s17, %s76_s28  }
  0x23   : > { %p1230_p0 = por %p89_p11, %p1187_p6  ;;  %p1237_p4 = por %p157_p12, %p51_p1 }
  0x24   : > { %1415 = sst [smem:[#allocation19_spill]] %s1220_s24  ;;  %s1420_s15 = sadd.s32 4294967294, %s1066_s25  }
  0x25   : > { %s1417_s11 = scalar_select %p1230_p0, 1, 0 }
  0x26   : > { %s1418_s27 = scalar_select %p1237_p4, 1, 0 }
  0x27   : > { %p163_p8 = scmp.eq.s32.totalorder %s1420_s15, 3  ;;  %p693_p2 = scmp.ge.s32.totalorder %s1066_s25, 4 }
  0x28   : > { %1419 = sst [smem:[#allocation20_spill]] %s1418_s27 }
  0x29   : > { %p1246_p9 = por %p163_p8, %p57_p5  ;;  %185 = sbr.rel (%p693_p2) target bundleno = 103 (0x67), region = 24 }
  0x2b   : > { %s1421_s2 = scalar_select %p1246_p9, 1, 0 }
  0x2d   : > { %1422 = sst [smem:[#allocation21_spill]] %s1421_s2 }
  0x30   : > { %188 = sbr.rel (!%p1179_p3) target bundleno = 76 (0x4c), region = 28  ;;  %s189_s26 = sand.u32 (%p1179_p3), 1, %s1046_s20  }
  0x31   : > { %s694_s28 = sshll.u32 (%p1179_p3), %s189_s26, 4  ;;  %s1254_s30 = scalar_lea.sflag (%p1179_p3), [#allocation5], %s189_s26 }
  0x32   : > { %s193_s5 = scalar_lea.vmem (%p1179_p3), [#allocation4], %s694_s28  ;;  %s735_s7 = smul.u32 (%p1179_p3), 5, %s1058_s23 }
  0x33   : > { %s209_s10 = sshll.u32 (%p1179_p3), %s193_s5, 4  ;;  %s885_s18 = scalar_lea.hbm (%p1179_p3), %s1386_s0, 1280  ;;  %s210_s10 = int_to_ptr.vmem [resolvable:$true] %s209_s10 }
  0x34   : > { %s204_s12 = sadd.s32 (%p1179_p3), %s735_s7, %s1192_s8 }
  0x35   : > { %s698_s13 = sshll.u32 (%p1179_p3), %s204_s12, 7 }
  0x36   : > { %s206_s4 = scalar_lea.hbm (%p1179_p3), %s1386_s0, %s698_s13 }
  0x37   : > { %s881_s24 = scalar_lea.hbm %s206_s4, 256  ;;  %p886_p3 = scmp.lt.u32.totalorder %s206_s4, %s1386_s0 }
  0x38   : > { %p882_p1 = scmp.ne.s32.totalorder %s206_s4, %s881_s24  ;;  %p887_p5 = scmp.lt.u32.totalorder %s885_s18, %s881_s24 }
  0x39   : > { %p889_p10 = scmp.lt.u32.totalorder %s881_s24, %s206_s4 }
  0x3a   : > { %p888_p6 = por %p887_p5, %p886_p3 }
  0x3c   : > { %p890_p11 = por %p889_p10, %p888_p6 }
  0x3e   : > { %p891_p12 = pnand %p890_p11, %p882_p1 }
  0x40   : > { %894 = shalt.err (!%p891_p12)
}
  0x41   : > { %s895_s26 = scalar_lea.vmem %s210_s10, 256  ;;  %s1068_s28 = smov [#allocation4]  }
  0x42   : > { %p896_p8 = scmp.ne.s32.totalorder %s210_s10, %s895_s26  ;;  %s899_s5 = sshll.u32 %s1068_s28, 4  ;;  %s900_s5 = int_to_ptr.vmem [resolvable:$false] %s899_s5 }
  0x43   : > { %s901_s7 = scalar_lea.vmem %s900_s5, 512  ;;  %p902_p2 = scmp.lt.s32.totalorder %s210_s10, %s900_s5 }
  0x44   : > { %p903_p9 = scmp.lt.s32.totalorder %s901_s7, %s895_s26 }
  0x46   : > { %p904_p4 = por %p903_p9, %p902_p2 }
  0x48   : > { %p905_p0 = pnand %p904_p4, %p896_p8 }
  0x4a   : > { %908 = shalt.err (!%p905_p0)
}
  0x4b   : > { %212 = dma.hbm_to_vmem [thread:$0]  %s206_s4, 256, %s210_s10, %s1254_s30  }
  0x4c PF: > { %s216_s18 = sand.u32 1, %s1034_s17   ;;  %s613_s20 = smul.u32 5, %s1058_s23 }
  0x4d   : > { %s701_s24 = sshll.u32 %s216_s18, 3  ;;  %s217_s4 = scalar_lea.sflag [#allocation8], %s216_s18 }
  0x4e   : > { %s614_s27 = sadd.s32 %s1192_s8, %s613_s20  ;;  %s220_s12 = scalar_lea.vmem [#allocation7], %s701_s24 }
  0x4f   : > { %s703_s2 = sshll.u32 %s614_s27, 7  ;;  %s231_s13 = sshll.u32 %s220_s12, 4  ;;  %s1274_s13 = int_to_ptr.vmem [resolvable:$true] %s231_s13 }
  0x50   : > { %s616_s6 = scalar_lea.hbm %s1387_s1, %s703_s2  ;;  %s913_s8 = scalar_lea.hbm %s1387_s1, 1280 }
  0x51   : > { %s617_s26 = scalar_lea.hbm %s616_s6, 256  ;;  %s937_s30 = scalar_lea.hbm %s616_s6, 384 }
  0x52   : > { %p910_p0 = scmp.ne.s32.totalorder %s617_s26, %s937_s30  ;;  %p914_p1 = scmp.lt.u32.totalorder %s617_s26, %s1387_s1 }
  0x53   : > { %p915_p3 = scmp.lt.u32.totalorder %s913_s8, %s937_s30  ;;  %p917_p6 = scmp.lt.u32.totalorder %s937_s30, %s617_s26 }
  0x54   : > { %p911_p4 = pnand %p910_p0, %p1224_p13 }
  0x55   : > { %p916_p5 = por %p915_p3, %p914_p1 }
  0x56   : > { %p912_p9 = pneg %p911_p4 }
  0x57   : > { %p918_p10 = por %p917_p6, %p916_p5 }
  0x59   : > { %p919_p11 = pnand %p918_p10, %p912_p9 }
  0x5b   : > { %922 = shalt.err (!%p919_p11)
}
  0x5c   : > { %s923_s18 = scalar_lea.vmem %s1274_s13, 128  ;;  %s1069_s20 = smov [#allocation7]  }
  0x5d   : > { %p924_p12 = scmp.ne.s32.totalorder %s1274_s13, %s923_s18  ;;  %s927_s24 = sshll.u32 %s1069_s20, 4  ;;  %s928_s24 = int_to_ptr.vmem [resolvable:$false] %s927_s24 }
  0x5e   : > { %s929_s27 = scalar_lea.vmem %s928_s24, 256  ;;  %p930_p0 = scmp.lt.s32.totalorder %s1274_s13, %s928_s24 }
  0x5f   : > { %p925_p8 = pnand %p924_p12, %p1224_p13  ;;  %p931_p4 = scmp.lt.s32.totalorder %s929_s27, %s923_s18 }
  0x61   : > { %p926_p2 = pneg %p925_p8  ;;  %p932_p1 = por %p931_p4, %p930_p0 }
  0x63   : > { %p933_p3 = pnand %p932_p1, %p926_p2 }
  0x65   : > { %936 = shalt.err (!%p933_p3)
}
  0x66   : > { %736 = dma.hbm_to_vmem [thread:$0]  (%p1224_p13), %s617_s26, 128, %s1274_s13, %s217_s4  }
  0x67 PF: > { %p704_p9 = scmp.ge.s32.totalorder %s1066_s25, 1  ;;  %p236_p5 = scmp.lt.s32.totalorder %s1066_s25, 5 }
  0x69   : > { %p237_p6 = pnand %p704_p9, %p236_p5 }
  0x6a   : > { %s1295_s2 = sand.u32 (!%p237_p6), 1, %s1042_s19  }
  0x6b   : > { %240 = sbr.rel (%p237_p6) target bundleno = 500 (0x1f4), region = 36  ;;  %s705_s12 = sshll.u32 (!%p237_p6), %s1295_s2, 4 }
  0x6c   : > { %s243_s14 = scalar_lea.sflag (!%p237_p6), [#allocation5], %s1295_s2  ;;  %s246_s29 = scalar_lea.vmem (!%p237_p6), [#allocation4], %s705_s12 }
  0x72   : > { %1011 = dma.done.wait (%p1201_p7), %s243_s14, 256  }
  0x73   : > { %1013 = vsyncadd (%p1201_p7), %s243_s14, 4294967040  ;;  %s251_s13 = sand.u32 1, %s1030_s16   ;;  %p1423_p13 = scmp.ne.s32.totalorder %s1417_s11, 0 }
  0x74   : > { %s706_s15 = sshll.u32 %s251_s13, 3  ;;  %s252_s6 = scalar_lea.sflag [#allocation8], %s251_s13 }
  0x75   : > { %s255_s26 = scalar_lea.vmem [#allocation7], %s706_s15 }
  0x76   : > { %1015 = dma.done.wait (%p1423_p13), %s252_s6, 128  }
  0x77   : > { %1017 = vsyncadd (%p1423_p13), %s252_s6, 4294967168  ;;  %v294_v0 = vld [vmem:[%s246_s29 + $0x8] sm:$0xff]  ;;  %v297_v1 = vld [vmem:[%s255_s26] sm:$0xff]  ;;  %s1070_s4 = smov 126   ;;  %s1071_s30 = smov 127   ;;  %v1077_v4 = vmov 0.0  }
  0x78   : > { %v849_v2 = vpack.i.bf16 %v297_v1, %v294_v0  ;;  %v293_v3 = vld [vmem:[%s246_s29] sm:$0xff]  ;;  %s1072_s9 = smov 110   ;;  %s1073_s10 = smov 108   ;;  %548 = vmatprep.mubr.f32.mxu0 %v1077_v4  ;;  %v1078_v5 = vmov 0   ;;  %vm315_vm0 = vcmask 1039360   ;;  %vm353_vm1 = vcmask 900096  }
  0x79   : > { %s1074_s28 = smov 109   ;;  %s1075_s11 = smov 91   ;;  %879 = vset.pattern.permute.xlu1 %v1078_v5  ;;  %880 = vset.pattern.permute.xlu0 %v1078_v5  ;;  %v474_v6 = vld [vmem:[%s1389_s3] sm:$0xff]  ;;  %vm334_vm2 = vcmask 1031168   ;;  %vm391_vm3 = vcmask 883712   ;;  %vm372_vm4 = vcmask 891904  }
  0x7a   : > { %850 = vrot.lane.b32.xlu1 %v849_v2, %s1070_s4  ;;  %845 = vrot.lane.b32.xlu0 %v849_v2, %s1071_s30  ;;  %s1076_s8 = smov 92   ;;  %s1079_s5 = smov 90   ;;  %vm429_vm5 = vcmask 744448   ;;  %vm410_vm6 = vcmask 752640   ;;  %vm448_vm7 = vcmask 736256   ;;  %vm480_vm8 = vcmask 588800  }
  0x7b   : > { %s1424_s27 = sld [smem:[#allocation22_spill]]  ;;  %s710_s14 = sshll.u32 %s1054_s22, 1 }
  0x7c   : > { %s711_s29 = sshll.u32 %s1050_s21, 2  ;;  %s1425_s15 = sld [smem:[#allocation20_spill]] }
  0x7d   : > { %s570_s13 = sadd.s32 %s711_s29, %s710_s14  ;;  %s284_s26 = scalar_lea.vmem [#allocation9], %s705_s12 }
  0x7e   : > { %855 = vrot.lane.b32.xlu1 %v849_v2, %s1072_s9  ;;  %309 = vrot.lane.b32.xlu0 %v293_v3, %s1071_s30  ;;  %s712_s6 = sshll.u32 %s570_s13, 7  ;;  %s558_s21 = scalar_lea.sflag [#allocation6], %s1295_s2 }
  0x7f   : > { %s1080_s12 = smov [#allocation9]  }
  0x81   : > { %v455_v61 = vld [vmem:[%s1424_s27] sm:$0xff] }
  0x82   : > { %347 = vrot.lane.b32.xlu1 %v293_v3, %s1072_s9  ;;  %328 = vrot.lane.b32.xlu0 %v293_v3, %s1070_s4  ;;  %s574_s4 = sshll.u32 %s284_s26, 4  ;;  %p1427_p10 = scmp.ne.s32.totalorder %s1425_s15, 0  ;;  %s1325_s4 = int_to_ptr.vmem [resolvable:$true] %s574_s4 }
  0x83   : > { %s938_s22 = scalar_lea.vmem %s1325_s4, 256 }
  0x84   : > { %p939_p7 = scmp.ne.s32.totalorder %s1325_s4, %s938_s22 }
  0x86   : > { %865 = vrot.lane.b32.xlu1 %v849_v2, %s1073_s10  ;;  %860 = vrot.lane.b32.xlu0 %v849_v2, %s1074_s28  ;;  %p940_p11 = pnand %p939_p7, %p1427_p10 }
  0x88   : > { %p941_p12 = pneg %p940_p11 }
  0x8a   : > { %385 = vrot.lane.b32.xlu1 %v293_v3, %s1073_s10  ;;  %366 = vrot.lane.b32.xlu0 %v293_v3, %s1074_s28  ;;  %s1426_s10 = sld [smem:[#allocation23_spill]] }
  0x8e   : > { %875 = vrot.lane.b32.xlu1 %v849_v2, %s1075_s11  ;;  %870 = vrot.lane.b32.xlu0 %v849_v2, %s1076_s8 }
  0x90   : > { %s1323_s28 = scalar_lea.hbm %s1426_s10, %s712_s6 }
  0x92   : > { %423 = vrot.lane.b32.xlu1 %v293_v3, %s1075_s11  ;;  %404 = vrot.lane.b32.xlu0 %v293_v3, %s1076_s8  ;;  %s942_s11 = sshll.u32 %s1080_s12, 4  ;;  %s943_s11 = int_to_ptr.vmem [resolvable:$false] %s942_s11 }
  0x93   : > { %s944_s8 = scalar_lea.vmem %s943_s11, 512  ;;  %p945_p8 = scmp.lt.s32.totalorder %s1325_s4, %s943_s11 }
  0x94   : > { %p946_p2 = scmp.lt.s32.totalorder %s944_s8, %s938_s22 }
  0x96   : > { %446 = vrot.lane.b32.xlu1 %v297_v1, %s1079_s5  ;;  %444 = vrot.lane.b32.xlu0 %v294_v0, %s1079_s5  ;;  %p947_p0 = por %p946_p2, %p945_p8 }
  0x98   : > { %p948_p4 = pnand %p947_p0, %p941_p12 }
  0x9a   : > { %442 = vrot.lane.b32.xlu0 %v293_v3, %s1079_s5  ;;  %477 = vperm.xlu1 %879, %v474_v6  }
  0xec   : > { %v851_v7 = vpop.permute.xlu1 %850  ;;  %v846_v8 = vpop.permute.xlu0 %845 }
  0xed   : > { %v848_v9 = vunpack.i.h.bf16 %v846_v8  ;;  %v847_v10 = vunpack.i.l.bf16 %v846_v8  ;;  %v853_v11 = vunpack.i.h.bf16 %v851_v7  ;;  %v852_v12 = vunpack.i.l.bf16 %v851_v7 }
  0xef   : > { %v317_v13 = vsel %vm315_vm0, %v847_v10, %v848_v9  ;;  %v336_v21 = vsel %vm334_vm2, %v852_v12, %v853_v11 }
  0xf0   : > { %v856_v14 = vpop.permute.xlu1 %855  ;;  %v310_v15 = vpop.permute.xlu0 %309  ;;  %v719_v16 = vpack.c.bf16 %v317_v13, %v294_v0 }
  0xf1   : > { %v858_v17 = vunpack.i.h.bf16 %v856_v14  ;;  %v857_v18 = vunpack.i.l.bf16 %v856_v14  ;;  %v316_v19 = vsel %vm315_vm0, %v310_v15, %v847_v10 }
  0xf2   : > { %720 = vmatprep.subr.bf16.mxu0 %v719_v16  ;;  %v721_v20 = vpack.c.bf16 %v316_v19, %v293_v3 }
  0xf3   : > { %v355_v22 = vsel %vm353_vm1, %v857_v18, %v858_v17 }
  0xf4   : > { %v348_v23 = vpop.permute.xlu1 %347  ;;  %722 = vmatpush1.bf16.msra.mxu0 %v721_v20  ;;  %v329_v24 = vpop.permute.xlu0 %328  ;;  %v723_v25 = vpack.c.bf16 %v355_v22, %v336_v21 }
  0xf5   : > { %v354_v26 = vsel %vm353_vm1, %v348_v23, %v857_v18  ;;  %v335_v27 = vsel %vm334_vm2, %v329_v24, %v852_v12 }
  0xf6   : > { %v725_v28 = vpack.c.bf16 %v354_v26, %v335_v27  ;;  %724 = vmatprep.subr.bf16.mxu0 %v723_v25 }
  0xf8   : > { %v866_v29 = vpop.permute.xlu1 %865  ;;  %726 = vmatpush1.bf16.msra.mxu0 %v725_v28  ;;  %v861_v30 = vpop.permute.xlu0 %860 }
  0xf9   : > { %v868_v31 = vunpack.i.h.bf16 %v866_v29  ;;  %v867_v32 = vunpack.i.l.bf16 %v866_v29  ;;  %v863_v33 = vunpack.i.h.bf16 %v861_v30  ;;  %v862_v34 = vunpack.i.l.bf16 %v861_v30 }
  0xfb   : > { %v374_v35 = vsel %vm372_vm4, %v862_v34, %v863_v33  ;;  %v393_v36 = vsel %vm391_vm3, %v867_v32, %v868_v31 }
  0xfc   : > { %v386_v37 = vpop.permute.xlu1 %385  ;;  %v367_v38 = vpop.permute.xlu0 %366  ;;  %v727_v39 = vpack.c.bf16 %v393_v36, %v374_v35 }
  0xfd   : > { %v392_v40 = vsel %vm391_vm3, %v386_v37, %v867_v32  ;;  %v373_v41 = vsel %vm372_vm4, %v367_v38, %v862_v34 }
  0xfe   : > { %v729_v42 = vpack.c.bf16 %v392_v40, %v373_v41  ;;  %728 = vmatprep.subr.bf16.mxu0 %v727_v39 }
 0x100   : > { %v876_v43 = vpop.permute.xlu1 %875  ;;  %v871_v44 = vpop.permute.xlu0 %870  ;;  %730 = vmatpush1.bf16.msra.mxu0 %v729_v42 }
 0x101   : > { %v878_v45 = vunpack.i.h.bf16 %v876_v43  ;;  %v877_v46 = vunpack.i.l.bf16 %v876_v43  ;;  %v873_v47 = vunpack.i.h.bf16 %v871_v44  ;;  %v872_v48 = vunpack.i.l.bf16 %v871_v44 }
 0x103   : > { %v412_v49 = vsel %vm410_vm6, %v872_v48, %v873_v47  ;;  %v431_v50 = vsel %vm429_vm5, %v877_v46, %v878_v45 }
 0x104   : > { %v424_v51 = vpop.permute.xlu1 %423  ;;  %v405_v52 = vpop.permute.xlu0 %404  ;;  %v731_v53 = vpack.c.bf16 %v431_v50, %v412_v49 }
 0x105   : > { %v430_v54 = vsel %vm429_vm5, %v424_v51, %v877_v46  ;;  %v411_v55 = vsel %vm410_vm6, %v405_v52, %v872_v48 }
 0x106   : > { %v733_v56 = vpack.c.bf16 %v430_v54, %v411_v55  ;;  %732 = vmatprep.subr.bf16.mxu0 %v731_v53 }
 0x108   : > { %v447_v57 = vpop.permute.xlu1 %446  ;;  %v445_v58 = vpop.permute.xlu0 %444  ;;  %734 = vmatpush1.bf16.msra.mxu0 %v733_v56 }
 0x109   : > { %v450_v59 = vsel %vm448_vm7, %v445_v58, %v447_v57 }
 0x10a   : > { %500 = vmatprep.subr.mxu0 %v450_v59 }
 0x10c   : > { %v443_v60 = vpop.permute.xlu0 %442 }
 0x10d   : > { %v449_v62 = vsel %vm448_vm7, %v443_v60, %v445_v58 }
 0x10e   : > { %501 = vmatpush1.msra.mxu0 %v449_v62 }
 0x10f   : > { %708 = vmatmul.mubr.msk.f32.vlgmr.msra.gmra.mrb[0].mxu0 %vm480_vm8, %v455_v61 }
 0x119   : > { %v478_v63 = vpop.permute.xlu1 %477 }
 0x1e2   : > { %v550_v0 = vpop.f32.mrb[0].mxu0 }
 0x1e3   : > { %v551_v1 = vadd.f32 %v550_v0, %v478_v63  ;;  %v552_v2 = vpop.f32.mrb[1].mxu0 }
 0x1e4   : > { %v553_v3 = vadd.f32 %v552_v2, %v478_v63 }
 0x1e5   : > { %555 = vst [vmem:[%s284_s26] sm:$0xff] %v551_v1 }
 0x1e6   : > { %556 = vst [vmem:[%s284_s26 + $0x8] sm:$0xff] %v553_v3 }
 0x1e7   : > { %951 = shalt.err (!%p948_p4)
}
 0x1e8   : > { %s952_s2 = scalar_lea.hbm %s1323_s28, 256  ;;  %s956_s18 = scalar_lea.hbm %s1426_s10, 1024 }
 0x1e9   : > { %p953_p1 = scmp.ne.s32.totalorder %s1323_s28, %s952_s2  ;;  %p957_p5 = scmp.lt.u32.totalorder %s1323_s28, %s1426_s10 }
 0x1ea   : > { %p958_p6 = scmp.lt.u32.totalorder %s956_s18, %s952_s2  ;;  %p960_p7 = scmp.lt.u32.totalorder %s952_s2, %s1323_s28 }
 0x1eb   : > { %p954_p3 = pnand %p953_p1, %p1427_p10 }
 0x1ec   : > { %p959_p13 = por %p958_p6, %p957_p5 }
 0x1ed   : > { %p955_p9 = pneg %p954_p3 }
 0x1ee   : > { %p961_p11 = por %p960_p7, %p959_p13 }
 0x1f0   : > { %p962_p12 = pnand %p961_p11, %p955_p9 }
 0x1f2   : > { %965 = shalt.err (!%p962_p12)
}
 0x1f3   : > { %739 = dma.vmem_to_hbm [thread:$0]  (%p1427_p10), %s1325_s4, 256, %s1323_s28, %s558_s21  }
 0x1f4 PF: > { %s1428_s27 = sld [smem:[#allocation13_spill]]  ;;  %s1429_s14 = sld [smem:[#allocation21_spill]] }
 0x1f5   : > { %p745_p8 = scmp.ge.s32.totalorder %s1066_s25, 2 }
 0x1fa   : > { %s586_s29 = sand.u32 1, %s1428_s27   ;;  %p1430_p2 = scmp.ne.s32.totalorder %s1429_s14, 0 }
 0x1fb   : > { %s587_s13 = scalar_lea.sflag [#allocation6], %s586_s29 }
 0x1fc   : > { %p742_p0 = pnand %p745_p8, %p1430_p2 }
 0x1fe   : > { %1019 = dma.done.wait (!%p742_p0), %s587_s13, 256  }
 0x1ff   : > { %1021 = vsyncadd (!%p742_p0), %s587_s13, 4294967040  ;;  %s23_s25 = sadd.s32 1, %s1066_s25   ;;  %s1431_s6 = sld [smem:[#allocation19_spill]] }
 0x200   : > { %p20_p4 = scmp.ge.s32.totalorder %s23_s25, 6   ;;  %s1432_s26 = sld [smem:[#allocation14_spill]] }
 0x201   : > { %s1433_s20 = sld [smem:[#allocation18_spill]]  ;;  %s1434_s22 = sld [smem:[#allocation15_spill]] }
 0x202   : > { %s1435_s4 = sld [smem:[#allocation16_spill]]  ;;  %s1436_s24 = sld [smem:[#allocation17_spill]] }
 0x203   : > { %s1437_s15 = smov %s1030_s16  ;;  %s1438_s16 = smov %s1034_s17 }
 0x204   : > { %s1440_s18 = smov %s1042_s19  ;;  %s1442_s21 = smov %s1058_s23 }
 0x205   : > { %s1439_s17 = smov %s1431_s6  ;;  %22 = sbr.rel (!%p20_p4) target bundleno = 14 (0xe), region = 94 }
 0x206   : > { %s1441_s19 = smov %s1432_s26 }
 0x208   : > { %s1443_s23 = smov %s1435_s4 }
 0x20c   :  { %592 = vsyncpa [#allocation5], 1 }
 0x20d   :  { %594 = vsyncpa [#allocation5 + $0x1], 1 }
 0x20e   :  { %595 = vsyncpa [#allocation8], 1 }
 0x20f   :  { %597 = vsyncpa [#allocation8 + $0x1], 1 }
 0x210   :  { %598 = vsyncpa [#allocation6], 1 }
 0x211   :  { %600 = vsyncpa [#allocation6 + $0x1], 1 }

</bundles_post_ra>
